<compile_context>
chip_gen: v7x
topology: tpu7x:2x2x1
jax: 0.10.0
libtpu: 0.0.40
codegen_flags: <defaults>
</compile_context>

<pallas_src>
import jax
import jax.numpy as jnp
from jax.experimental import pallas as pl
from jax.experimental.pallas import tpu as pltpu

EPS = 1e-6


def _awp_kernel(x_ref, w_ref, mask_ref, o_ref, m_sc, l_sc, acc_sc):
    """One (TB, TS, H) tile of the attention-weighted 'sum' pool.

    x_ref:    (TB, TS, H)  input states tile
    w_ref:    (1, 1, H)    attention vector (Linear(H, 1, bias=False).weight)
    mask_ref: (TB, TS, 1)  attention mask tile (f32)
    o_ref:    (TB, 1, H)   pooled output (written on the last sequence tile)
    m_sc / l_sc / acc_sc: running max / running masked-exp sum / f32 accum.
    """
    k = pl.program_id(1)

    @pl.when(k == 0)
    def _init():
        m_sc[...] = jnp.full(m_sc.shape, -jnp.inf, dtype=m_sc.dtype)
        l_sc[...] = jnp.zeros(l_sc.shape, dtype=l_sc.dtype)
        acc_sc[...] = jnp.zeros(acc_sc.shape, dtype=acc_sc.dtype)

    x = x_ref[...]                                   # (TB, TS, H)
    w = w_ref[...]                                   # (1, 1, H), f32
    mask = mask_ref[...]                             # (TB, TS, 1), f32

    # pos_weights = Linear(H -> 1, no bias).  VPU broadcast-multiply + lane
    # reduce keeps scores column-shaped (no (S,1)->(1,S) transpose and no
    # N=1 MXU matmul), in exact f32.
    s = jnp.sum(x * w, axis=-1, keepdims=True)       # (TB, TS, 1), f32

    # Online softmax over the sequence axis.  NOTE: as in the PyTorch module,
    # the max is over UNMASKED scores; the mask multiplies exp() afterwards.
    # (Faithful but numerically fragile if a masked position holds the max.)
    m_prev = m_sc[...]                               # (TB, 1, 1)
    m_new = jnp.maximum(m_prev, jnp.max(s, axis=1, keepdims=True))
    alpha = jnp.exp(m_prev - m_new)                  # rescale previous tiles
    p = jnp.exp(s - m_new) * mask                    # (TB, TS, 1)

    l_sc[...] = alpha * l_sc[...] + jnp.sum(p, axis=1, keepdims=True)
    # Weighted reduction over S: VPU multiply + sublane reduce.  x stays in
    # its input dtype (bf16 promotes in-register); accumulation is f32.
    acc_sc[...] = alpha * acc_sc[...] + jnp.sum(x * p, axis=1, keepdims=True)
    m_sc[...] = m_new

    @pl.when(k == pl.num_programs(1) - 1)
    def _finalize():
        # Exact divide rather than pl.reciprocal(approx=True): this runs once
        # per batch tile (off the per-S-step hot path) and preserves 1e-5
        # parity with the f32 reference.  If a whole row is masked the result
        # is ~0 only thanks to EPS, same as the PyTorch module.
        o_ref[...] = (acc_sc[...] / (l_sc[...] + EPS)).astype(o_ref.dtype)


def _largest_divisor(n, cap, quantum=1):
    """Largest t <= cap with n % t == 0 and t % quantum == 0 (fallback: n)."""
    if n <= cap:
        return n
    for t in range(min(cap, n), 0, -1):
        if n % t == 0 and t % quantum == 0:
            return t
    return n


def _pick_tiles(B, S, H, itemsize, budget_bytes=2 << 20):
    # Sequence tile: whole S if it fits the per-block budget, else the largest
    # divisor of S that is a multiple of 8 (sublane constraint) and fits.
    max_ts = max(8, budget_bytes // max(1, H * itemsize))
    ts = S if S <= max_ts else _largest_divisor(S, max_ts, quantum=8)
    # Batch tile: as many full rows as still fit the budget (divisor of B).
    max_tb = max(1, budget_bytes // max(1, ts * H * itemsize))
    tb = B if B <= max_tb else _largest_divisor(B, max_tb, quantum=1)
    return tb, ts


def attention_weighted_pool(input_states, attention_mask, attn_weight,
                            *, batch_tile=None, seq_tile=None):
    """input_states: [B,S,H], attention_mask: [B,S], attn_weight: [1,H] -> [B,H]."""
    B, S, H = input_states.shape
    itemsize = jnp.dtype(input_states.dtype).itemsize

    tb_auto, ts_auto = _pick_tiles(B, S, H, itemsize)
    tb = batch_tile if batch_tile is not None else tb_auto
    ts = seq_tile if seq_tile is not None else ts_auto
    assert B % tb == 0, "batch tile must divide B"
    assert S % ts == 0 and (ts % 8 == 0 or ts == S), "bad sequence tile"
    # TODO(synk): if S has no divisor that is a multiple of 8, ts falls back to
    # the full sequence; host-side padding (mask=0) would re-enable S tiling.

    # Host-side (free) re-layouts so the kernel never shuffles lanes/sublanes.
    w3 = attn_weight.astype(jnp.float32).reshape(1, 1, H)
    mask3 = attention_mask.astype(jnp.float32).reshape(B, S, 1)

    grid = (B // tb, S // ts)

    # Blocks are capped at a few MiB so default scoped-VMEM limits suffice;
    # still pass a generous-but-bounded ceiling so the whole-sequence fallback
    # can exploit the larger v5e/v6e VMEM without tripping the default limit.
    x_blk_bytes = tb * ts * H * itemsize
    vmem_limit = int(min(max(4 * x_blk_bytes + (6 << 20), 16 << 20), 48 << 20))

    out = pl.pallas_call(
        _awp_kernel,
        out_shape=jax.ShapeDtypeStruct((B, 1, H), input_states.dtype),
        grid_spec=pltpu.PrefetchScalarGridSpec(
            num_scalar_prefetch=0,
            grid=grid,
            in_specs=[
                pl.BlockSpec((tb, ts, H), lambda b, k: (b, k, 0)),   # x
                pl.BlockSpec((1, 1, H), lambda b, k: (0, 0, 0)),     # attn weight
                pl.BlockSpec((tb, ts, 1), lambda b, k: (b, k, 0)),   # mask
            ],
            out_specs=pl.BlockSpec((tb, 1, H), lambda b, k: (b, 0, 0)),
            scratch_shapes=[
                pltpu.VMEM((tb, 1, 1), jnp.float32),    # running max
                pltpu.VMEM((tb, 1, 1), jnp.float32),    # running masked-exp sum
                pltpu.VMEM((tb, 1, H), jnp.float32),    # output accumulator
            ],
        ),
        compiler_params=pltpu.CompilerParams(
            dimension_semantics=("parallel", "arbitrary"),
            vmem_limit_bytes=vmem_limit,
        ),
    )(input_states, w3, mask3)
    # TODO(synk): pool_method in {'min','max','max_p','detail'} (and the
    # batch_offsets buffer used only by 'max_p') are not implemented; this
    # kernel realizes the default 'sum' pooling.
    return out.reshape(B, H)


def _reference(input_states, attention_mask, attn_weight):
    # Pure-JAX replica of the PyTorch forward (pool_method='sum').
    scores = jnp.sum(input_states * attn_weight.reshape(1, 1, -1), axis=-1)  # (B,S)
    scores = jnp.exp(scores - jnp.max(scores, axis=-1, keepdims=True))
    scores = scores * attention_mask.astype(jnp.float32)
    scores = scores / (jnp.sum(scores, axis=1, keepdims=True) + EPS)
    return jnp.sum(input_states * scores[..., None], axis=1)


def _run_case(key, B, S, H, **tile_kwargs):
    kx, kw, km = jax.random.split(key, 3)
    x = jax.random.normal(kx, (B, S, H), dtype=jnp.float32)
    # Deterministic stand-in for nn.Linear(H, 1, bias=False).weight -> [1, H].
    w = jax.random.normal(kw, (1, H), dtype=jnp.float32) * (1.0 / jnp.sqrt(H))
    mask = (jax.random.uniform(km, (B, S)) > 0.25).astype(jnp.float32)
    mask = mask.at[:, 0].set(1.0)   # keep >= 1 valid position per row

    out = attention_weighted_pool(x, mask, w, **tile_kwargs)
    out = jax.block_until_ready(out)
    ref = _reference(x, mask, w)
    assert out.shape == (B, H)
    assert jnp.allclose(out, ref, atol=1e-5, rtol=1e-5), \
        f"mismatch vs reference for shape {(B, S, H)} / {tile_kwargs}"


if __name__ == "__main__":
    key = jax.random.PRNGKey(0)
    k1, k2 = jax.random.split(key)
    # Small default case: one (TB, S, H) block per batch tile.
    _run_case(k1, B=2, S=8, H=32)
    # Exercise the multi-tile online-softmax path (2 batch tiles x 2 seq tiles).
    _run_case(k2, B=2, S=16, H=32, batch_tile=1, seq_tile=8)
    print("KERNEL_OK")
</pallas_src>

<mosaic_0001>
module attributes {stable_mosaic.version = 11 : i64} {
  func.func @_awp_kernel(%arg0: i32, %arg1: i32, %arg2: memref<2x8x32xf32, #tpu.memory_space<vmem>>, %arg3: memref<1x1x32xf32, #tpu.memory_space<vmem>>, %arg4: memref<2x8x1xf32, #tpu.memory_space<vmem>>, %arg5: memref<2x1x32xf32, #tpu.memory_space<vmem>>, %arg6: memref<2x1x1xf32, #tpu.memory_space<vmem>>, %arg7: memref<2x1x1xf32, #tpu.memory_space<vmem>>, %arg8: memref<2x1x32xf32, #tpu.memory_space<vmem>>) attributes {dimension_semantics = [#tpu.dimension_semantics<parallel>, #tpu.dimension_semantics<arbitrary>], iteration_bounds = array<i64: 1, 1>, scalar_prefetch = 0 : i64, scratch_operands = 3 : i64, tpu.core_type = #tpu.core_type<tc>, window_params = [{transform_indices = @transform_0, window_bounds = array<i64: 2, 8, 32>}, {pipeline_mode = #tpu.pipeline_mode<synchronous>, transform_indices = @transform_1, window_bounds = array<i64: 1, 1, 32>}, {transform_indices = @transform_2, window_bounds = array<i64: 2, 8, 1>}, {transform_indices = @transform_3, window_bounds = array<i64: 2, 1, 32>}]} {
    %c0_i32 = arith.constant 0 : i32
    %0 = arith.cmpi eq, %arg1, %c0_i32 : i32
    %1 = arith.extui %0 : i1 to i32
    %c0_i32_0 = arith.constant 0 : i32
    %2 = arith.cmpi ne, %1, %c0_i32_0 : i32
    scf.if %2 {
      %cst_32 = arith.constant 0xFF800000 : f32
      %39 = vector.broadcast %cst_32 : f32 to vector<2x1x1xf32>
      %c0_33 = arith.constant 0 : index
      %c0_34 = arith.constant 0 : index
      %c0_35 = arith.constant 0 : index
      %40 = vector.load %arg6[%c0_33, %c0_34, %c0_35] : memref<2x1x1xf32, #tpu.memory_space<vmem>>, vector<2x1x1xf32>
      tpu.vector_store %arg6[%c0_33, %c0_34, %c0_35], %39 {strides = array<i32>} : memref<2x1x1xf32, #tpu.memory_space<vmem>>, vector<2x1x1xf32>,
      %cst_36 = arith.constant 0.000000e+00 : f32
      %41 = vector.broadcast %cst_36 : f32 to vector<2x1x1xf32>
      %c0_37 = arith.constant 0 : index
      %c0_38 = arith.constant 0 : index
      %c0_39 = arith.constant 0 : index
      %42 = vector.load %arg7[%c0_37, %c0_38, %c0_39] : memref<2x1x1xf32, #tpu.memory_space<vmem>>, vector<2x1x1xf32>
      tpu.vector_store %arg7[%c0_37, %c0_38, %c0_39], %41 {strides = array<i32>} : memref<2x1x1xf32, #tpu.memory_space<vmem>>, vector<2x1x1xf32>,
      %cst_40 = arith.constant 0.000000e+00 : f32
      %43 = vector.broadcast %cst_40 : f32 to vector<2x1x32xf32>
      %c0_41 = arith.constant 0 : index
      %c0_42 = arith.constant 0 : index
      %c0_43 = arith.constant 0 : index
      %44 = vector.load %arg8[%c0_41, %c0_42, %c0_43] : memref<2x1x32xf32, #tpu.memory_space<vmem>>, vector<2x1x32xf32>
      tpu.vector_store %arg8[%c0_41, %c0_42, %c0_43], %43 {strides = array<i32>} : memref<2x1x32xf32, #tpu.memory_space<vmem>>, vector<2x1x32xf32>,
    } else {
    }
    %c0 = arith.constant 0 : index
    %c0_1 = arith.constant 0 : index
    %c0_2 = arith.constant 0 : index
    %3 = vector.load %arg2[%c0, %c0_1, %c0_2] : memref<2x8x32xf32, #tpu.memory_space<vmem>>, vector<2x8x32xf32>
    %c0_3 = arith.constant 0 : index
    %c0_4 = arith.constant 0 : index
    %c0_5 = arith.constant 0 : index
    %4 = vector.load %arg3[%c0_3, %c0_4, %c0_5] : memref<1x1x32xf32, #tpu.memory_space<vmem>>, vector<1x1x32xf32>
    %c0_6 = arith.constant 0 : index
    %c0_7 = arith.constant 0 : index
    %c0_8 = arith.constant 0 : index
    %5 = vector.load %arg4[%c0_6, %c0_7, %c0_8] : memref<2x8x1xf32, #tpu.memory_space<vmem>>, vector<2x8x1xf32>
    %6 = vector.broadcast %4 : vector<1x1x32xf32> to vector<2x8x32xf32>
    %7 = arith.mulf %3, %6 : vector<2x8x32xf32>
    %cst = arith.constant dense<0.000000e+00> : vector<2x8xf32>
    %8 = vector.multi_reduction <add>, %7, %cst [2] : vector<2x8x32xf32> to vector<2x8xf32>
    %9 = vector.shape_cast %8 : vector<2x8xf32> to vector<2x8x1xf32>
    %c0_9 = arith.constant 0 : index
    %c0_10 = arith.constant 0 : index
    %c0_11 = arith.constant 0 : index
    %10 = vector.load %arg6[%c0_9, %c0_10, %c0_11] : memref<2x1x1xf32, #tpu.memory_space<vmem>>, vector<2x1x1xf32>
    %cst_12 = arith.constant dense<0xFF800000> : vector<2x1xf32>
    %11 = vector.multi_reduction <maximumf>, %9, %cst_12 [1] : vector<2x8x1xf32> to vector<2x1xf32>
    %12 = vector.shape_cast %11 : vector<2x1xf32> to vector<2x1x1xf32>
    %13 = arith.maximumf %10, %12 : vector<2x1x1xf32>
    %14 = arith.subf %10, %13 : vector<2x1x1xf32>
    %15 = math.exp %14 : vector<2x1x1xf32>
    %16 = vector.broadcast %13 : vector<2x1x1xf32> to vector<2x8x1xf32>
    %17 = arith.subf %9, %16 : vector<2x8x1xf32>
    %18 = math.exp %17 : vector<2x8x1xf32>
    %19 = arith.mulf %18, %5 : vector<2x8x1xf32>
    %c0_13 = arith.constant 0 : index
    %c0_14 = arith.constant 0 : index
    %c0_15 = arith.constant 0 : index
    %20 = vector.load %arg7[%c0_13, %c0_14, %c0_15] : memref<2x1x1xf32, #tpu.memory_space<vmem>>, vector<2x1x1xf32>
    %21 = arith.mulf %15, %20 : vector<2x1x1xf32>
    %cst_16 = arith.constant dense<0.000000e+00> : vector<2x1xf32>
    %22 = vector.multi_reduction <add>, %19, %cst_16 [1] : vector<2x8x1xf32> to vector<2x1xf32>
    %23 = vector.shape_cast %22 : vector<2x1xf32> to vector<2x1x1xf32>
    %24 = arith.addf %21, %23 : vector<2x1x1xf32>
    %c0_17 = arith.constant 0 : index
    %c0_18 = arith.constant 0 : index
    %c0_19 = arith.constant 0 : index
    %25 = vector.load %arg7[%c0_17, %c0_18, %c0_19] : memref<2x1x1xf32, #tpu.memory_space<vmem>>, vector<2x1x1xf32>
    tpu.vector_store %arg7[%c0_17, %c0_18, %c0_19], %24 {strides = array<i32>} : memref<2x1x1xf32, #tpu.memory_space<vmem>>, vector<2x1x1xf32>,
    %c0_20 = arith.constant 0 : index
    %c0_21 = arith.constant 0 : index
    %c0_22 = arith.constant 0 : index
    %26 = vector.load %arg8[%c0_20, %c0_21, %c0_22] : memref<2x1x32xf32, #tpu.memory_space<vmem>>, vector<2x1x32xf32>
    %27 = vector.broadcast %15 : vector<2x1x1xf32> to vector<2x1x32xf32>
    %28 = arith.mulf %27, %26 : vector<2x1x32xf32>
    %29 = vector.broadcast %19 : vector<2x8x1xf32> to vector<2x8x32xf32>
    %30 = arith.mulf %3, %29 : vector<2x8x32xf32>
    %cst_23 = arith.constant dense<0.000000e+00> : vector<2x32xf32>
    %31 = vector.multi_reduction <add>, %30, %cst_23 [1] : vector<2x8x32xf32> to vector<2x32xf32>
    %32 = vector.shape_cast %31 : vector<2x32xf32> to vector<2x1x32xf32>
    %33 = arith.addf %28, %32 : vector<2x1x32xf32>
    %c0_24 = arith.constant 0 : index
    %c0_25 = arith.constant 0 : index
    %c0_26 = arith.constant 0 : index
    %34 = vector.load %arg8[%c0_24, %c0_25, %c0_26] : memref<2x1x32xf32, #tpu.memory_space<vmem>>, vector<2x1x32xf32>
    tpu.vector_store %arg8[%c0_24, %c0_25, %c0_26], %33 {strides = array<i32>} : memref<2x1x32xf32, #tpu.memory_space<vmem>>, vector<2x1x32xf32>,
    %c0_27 = arith.constant 0 : index
    %c0_28 = arith.constant 0 : index
    %c0_29 = arith.constant 0 : index
    %35 = vector.load %arg6[%c0_27, %c0_28, %c0_29] : memref<2x1x1xf32, #tpu.memory_space<vmem>>, vector<2x1x1xf32>
    tpu.vector_store %arg6[%c0_27, %c0_28, %c0_29], %13 {strides = array<i32>} : memref<2x1x1xf32, #tpu.memory_space<vmem>>, vector<2x1x1xf32>,
    %c0_i32_30 = arith.constant 0 : i32
    %36 = arith.cmpi eq, %arg1, %c0_i32_30 : i32
    %37 = arith.extui %36 : i1 to i32
    %c0_i32_31 = arith.constant 0 : i32
    %38 = arith.cmpi ne, %37, %c0_i32_31 : i32
    scf.if %38 {
      %c0_32 = arith.constant 0 : index
      %c0_33 = arith.constant 0 : index
      %c0_34 = arith.constant 0 : index
      %39 = vector.load %arg8[%c0_32, %c0_33, %c0_34] : memref<2x1x32xf32, #tpu.memory_space<vmem>>, vector<2x1x32xf32>
      %c0_35 = arith.constant 0 : index
      %c0_36 = arith.constant 0 : index
      %c0_37 = arith.constant 0 : index
      %40 = vector.load %arg7[%c0_35, %c0_36, %c0_37] : memref<2x1x1xf32, #tpu.memory_space<vmem>>, vector<2x1x1xf32>
      %cst_38 = arith.constant 9.99999997E-7 : f32
      %41 = vector.broadcast %cst_38 : f32 to vector<2x1x1xf32>
      %42 = arith.addf %40, %41 : vector<2x1x1xf32>
      %43 = vector.broadcast %42 : vector<2x1x1xf32> to vector<2x1x32xf32>
      %44 = arith.divf %39, %43 : vector<2x1x32xf32>
      %c0_39 = arith.constant 0 : index
      %c0_40 = arith.constant 0 : index
      %c0_41 = arith.constant 0 : index
      %45 = vector.load %arg5[%c0_39, %c0_40, %c0_41] : memref<2x1x32xf32, #tpu.memory_space<vmem>>, vector<2x1x32xf32>
      tpu.vector_store %arg5[%c0_39, %c0_40, %c0_41], %44 {strides = array<i32>} : memref<2x1x32xf32, #tpu.memory_space<vmem>>, vector<2x1x32xf32>,
    } else {
    }
    return
  }
  func.func @transform_0(%arg0: i32, %arg1: i32) -> (i32, i32, i32) {
    %c0_i32 = arith.constant 0 : i32
    %c0_i32_0 = arith.constant 0 : i32
    return %arg0, %arg1, %c0_i32 : i32, i32, i32
  }
  func.func @transform_1(%arg0: i32, %arg1: i32) -> (i32, i32, i32) {
    %c0_i32 = arith.constant 0 : i32
    %c0_i32_0 = arith.constant 0 : i32
    %c0_i32_1 = arith.constant 0 : i32
    %c0_i32_2 = arith.constant 0 : i32
    return %c0_i32, %c0_i32_0, %c0_i32_1 : i32, i32, i32
  }
  func.func @transform_2(%arg0: i32, %arg1: i32) -> (i32, i32, i32) {
    %c0_i32 = arith.constant 0 : i32
    %c0_i32_0 = arith.constant 0 : i32
    return %arg0, %arg1, %c0_i32 : i32, i32, i32
  }
  func.func @transform_3(%arg0: i32, %arg1: i32) -> (i32, i32, i32) {
    %c0_i32 = arith.constant 0 : i32
    %c0_i32_0 = arith.constant 0 : i32
    %c0_i32_1 = arith.constant 0 : i32
    return %arg0, %c0_i32, %c0_i32_0 : i32, i32, i32
  }
}

</mosaic_0001>

<bundles_post_ra>
// kernel: tpu_custom_call.1
= control target key start
LH: loop header
LB: loop body
LE: loop exit
PB: predicated region body
PF: predicated region fallthrough
CT: control target
= control target key end

     0   :  { %vm40_vm0 = vcmask 261120   ;;  %s349_s0 = inlined_call_operand.vmem [shape: f32[2,8,32], index: 0, kind: input, shape index: {}]   ;;  %s350_s1 = inlined_call_operand.vmem [shape: f32[1,1,32], index: 1, kind: input, shape index: {}]   ;;  %s351_s2 = inlined_call_operand.vmem [shape: f32[2,8,1], index: 2, kind: input, shape index: {}]   ;;  %s352_s3 = inlined_call_operand.hbm [shape: f32[2,1,32], index: 3, kind: output, shape index: {}]  }
   0x1   :  { %v291_v0 = vld [vmem:[%s349_s0] sm:$0xff]  ;;  %v299_v2 = vld [vmem:[%s349_s0 + $0x8] sm:$0xff] }
   0x2   :  { %v217_v1 = vld [vmem:[%s350_s1] ss:$0 sm:$0xff] }
   0x3   :  { %v38_v3 = vmul.f32 %v217_v1, %v291_v0  ;;  %v39_v4 = vmul.f32 %v217_v1, %v299_v2 }
   0x4   :  { %8 = vsyncpa [#allocation6], 0  ;;  %vm19_vm1 = vcmask 0   ;;  %v262_v7 = vmov -inf   ;;  %v263_v8 = vmov 0.0   ;;  %v264_v9 = vmov 0  }
   0x5   :  { %v41_v5 = vsel %vm40_vm0, %v38_v3, 0.0  ;;  %v44_v6 = vsel %vm40_vm0, %v39_v4, 0.0  ;;  %20 = vst.msk [vmem:[#allocation2] sm:$0x1] %vm19_vm1, %v262_v7  ;;  %21 = vst.msk [vmem:[#allocation2 + $0x1] sm:$0x1] %vm19_vm1, %v262_v7  ;;  %225 = vset.pattern.permute.xlu0 %v264_v9  ;;  %224 = vset.pattern.permute.xlu1 %v264_v9  ;;  %v71_v12 = vlaneseq }
   0x6   :  { %42 = vadd.xlane.f32.xlu0 %v41_v5  ;;  %22 = vst.msk [vmem:[#allocation3] sm:$0x1] %vm19_vm1, %v263_v8  ;;  %23 = vst.msk [vmem:[#allocation3 + $0x1] sm:$0x1] %vm19_vm1, %v263_v8  ;;  %vm24_vm2 = vcmask 253952   ;;  %v30_v42 = vld [vmem:[%s351_s2] sm:$0xff] }
   0x7   :  { %25 = vst.msk [vmem:[#allocation4] sm:$0x1] %vm24_vm2, %v263_v8  ;;  %26 = vst.msk [vmem:[#allocation4 + $0x1] sm:$0x1] %vm24_vm2, %v263_v8  ;;  %v72_v17 = vshrl.u32 %v71_v12, 7  ;;  %vm93_vm3 = vcmask 7168  }
   0x8   :  { %v31_v45 = vld [vmem:[%s351_s2 + $0x8] sm:$0xff]  ;;  %s265_s2 = smov [#allocation5]  }
   0x9   :  { %v311_v23 = vsub.s32 0, %v72_v17  ;;  %s206_s20 = sshll.u32 %s265_s2, 4  ;;  %s207_s20 = int_to_ptr.vmem [resolvable:$true] %s206_s20 }
   0xa   :  { %45 = vadd.xlane.f32.xlu0 %v44_v6  ;;  %s238_s21 = scalar_lea.vmem %s207_s20, 32  ;;  %p243_p1 = scmp.lt.s32.totalorder %s207_s20, %s207_s20 }
   0xb   :  { %p239_p0 = scmp.ne.s32.totalorder %s207_s20, %s238_s21  ;;  %p244_p2 = scmp.lt.s32.totalorder %s238_s21, %s238_s21 }
   0xc   :  { %v47_v22 = vld [vmem:[#allocation2] sm:$0x1]  ;;  %v48_v28 = vld [vmem:[#allocation2 + $0x1] sm:$0x1] }
   0xd   :  { %v89_v57 = vld [vmem:[#allocation3] sm:$0x1]  ;;  %v90_v63 = vld [vmem:[#allocation3 + $0x1] sm:$0x1]  ;;  %p245_p3 = por %p244_p2, %p243_p1 }
   0xf   :  { %p246_p4 = pnand %p245_p3, %p239_p0 }
  0x93   :  { %v43_v10 = vpop.xlane.xlu0 %42 }
  0x94   :  { %v49_v11 = vrot.slane %v43_v10, 4 }
  0x96   :  { %v50_v13 = vmax.f32 %v43_v10, %v49_v11 }
  0x97   :  { %v46_v14 = vpop.xlane.xlu0 %45 }
  0x98   :  { %v51_v15 = vrot.slane %v50_v13, 2  ;;  %v55_v16 = vrot.slane %v46_v14, 4 }
  0x9a   :  { %v52_v18 = vmax.f32 %v50_v13, %v51_v15  ;;  %v56_v19 = vmax.f32 %v46_v14, %v55_v16 }
  0x9c   :  { %v53_v20 = vrot.slane %v52_v18, 1  ;;  %v57_v21 = vrot.slane %v56_v19, 2 }
  0x9e   :  { %v54_v24 = vmax.f32 %v52_v18, %v53_v20  ;;  %v58_v25 = vmax.f32 %v56_v19, %v57_v21 }
  0xa0   :  { %v61_v26 = vmax.f32 %v47_v22, %v54_v24  ;;  %v59_v27 = vrot.slane %v58_v25, 1 }
  0xa2   :  { %v63_v29 = vsub.f32 %v47_v22, %v61_v26  ;;  %v74_v30 = vrot.slane %v61_v26, %v311_v23  ;;  %166 = vst.msk [vmem:[#allocation2] sm:$0x1] %vm19_vm1, %v61_v26  ;;  %v60_v31 = vmax.f32 %v58_v25, %v59_v27  ;;  %v113_v26 = vld [vmem:[#allocation4] sm:$0x1] }
  0xa4   :  { %v65_v32 = vmul.f32 1.442695, %v63_v29  ;;  %v81_v33 = vsub.f32 %v43_v10, %v74_v30  ;;  %v62_v34 = vmax.f32 %v48_v28, %v60_v31 }
  0xa6   :  { %226 = vpow2.f32 %v65_v32  ;;  %v83_v35 = vmul.f32 1.442695, %v81_v33  ;;  %v78_v36 = vrot.slane %v62_v34, %v311_v23  ;;  %167 = vst.msk [vmem:[#allocation2 + $0x1] sm:$0x1] %vm19_vm1, %v62_v34  ;;  %v64_v38 = vsub.f32 %v48_v28, %v62_v34 }
  0xa8   :  { %228 = vpow2.f32 %v83_v35  ;;  %v82_v37 = vsub.f32 %v46_v14, %v78_v36  ;;  %v67_v40 = vmul.f32 1.442695, %v64_v38 }
  0xaa   :  { %v85_v39 = vmul.f32 1.442695, %v82_v37 }
  0xac   :  { %230 = vpow2.f32 %v85_v39 }
  0xad   :  { %232 = vpow2.f32 %v67_v40 }
  0xb0   :  { %v227_v41 = vpop.eup %226 }
  0xb1   :  { %117 = vperm.xlu0 %225, %v227_v41   ;;  %v91_v60 = vmul.f32 %v227_v41, %v89_v57 }
  0xb2   :  { %v229_v43 = vpop.eup %228 }
  0xb3   :  { %v87_v44 = vmul.f32 %v229_v43, %v30_v42 }
  0xb5   :  { %137 = vperm.xlu1 %224, %v87_v44   ;;  %v94_v46 = vsel %vm93_vm3, %v87_v44, 0.0 }
  0xb6   :  { %v231_v47 = vpop.eup %230  ;;  %v95_v48 = vrot.slane %v94_v46, 4 }
  0xb7   :  { %v88_v49 = vmul.f32 %v231_v47, %v31_v45  ;;  %v233_v54 = vpop.eup %232 }
  0xb8   :  { %v96_v50 = vadd.f32 %v95_v48, %v94_v46  ;;  %v92_v4 = vmul.f32 %v233_v54, %v90_v63 }
  0xb9   :  { %v101_v51 = vsel %vm93_vm3, %v88_v49, 0.0  ;;  %142 = vperm.xlu1 %224, %v88_v49  }
  0xba   :  { %v97_v52 = vrot.slane %v96_v50, 2  ;;  %v102_v53 = vrot.slane %v101_v51, 4 }
  0xbc   :  { %v98_v55 = vadd.f32 %v97_v52, %v96_v50  ;;  %v103_v56 = vadd.f32 %v102_v53, %v101_v51 }
  0xbd   :  { %126 = vperm.xlu1 %224, %v233_v54  }
  0xbe   :  { %v99_v58 = vrot.slane %v98_v55, 1  ;;  %v104_v59 = vrot.slane %v103_v56, 2 }
  0xc0   :  { %v100_v61 = vadd.f32 %v99_v58, %v98_v55  ;;  %v105_v62 = vadd.f32 %v104_v59, %v103_v56 }
  0xc2   :  { %v108_v1 = vadd.f32 %v100_v61, %v91_v60  ;;  %v106_v3 = vrot.slane %v105_v62, 1 }
  0xc4   :  { %111 = vst.msk [vmem:[#allocation3] sm:$0x1] %vm19_vm1, %v108_v1  ;;  %v107_v5 = vadd.f32 %v106_v3, %v105_v62 }
  0xc6   :  { %v109_v6 = vadd.f32 %v107_v5, %v92_v4 }
  0xc8   :  { %112 = vst.msk [vmem:[#allocation3 + $0x1] sm:$0x1] %vm19_vm1, %v109_v6 }
  0xcb   :  { %v173_v7 = vld [vmem:[#allocation3] sm:$0x1] }
  0xcc   :  { %v175_v8 = vadd.f32 1e-06, %v173_v7 }
  0xce   :  { %179 = vperm.xlu1 %224, %v175_v8  }
  0xcf   :  { %v174_v9 = vld [vmem:[#allocation3 + $0x1] sm:$0x1] }
  0xd0   :  { %v176_v10 = vadd.f32 1e-06, %v174_v9 }
  0xd2   :  { %188 = vperm.xlu1 %224, %v176_v10  }
 0x130   :  { %v118_v18 = vpop.permute.xlu0 %117 }
 0x131   :  { %v123_v22 = vrot.slane %v118_v18, %v311_v23 }
 0x133   :  { %v133_v29 = vmul.f32 %v123_v22, %v113_v26 }
 0x134   :  { %v138_v11 = vpop.permute.xlu1 %137 }
 0x135   :  { %v145_v12 = vmul.f32 %v138_v11, %v291_v0 }
 0x137   :  { %v147_v13 = vsel %vm40_vm0, %v145_v12, 0.0 }
 0x138   :  { %v148_v14 = vrot.slane %v147_v13, 4  ;;  %v143_v15 = vpop.permute.xlu1 %142 }
 0x139   :  { %v146_v16 = vmul.f32 %v143_v15, %v299_v2  ;;  %v114_v2 = vld [vmem:[#allocation4 + $0x1] sm:$0x1] }
 0x13a   :  { %v149_v17 = vadd.f32 %v148_v14, %v147_v13 }
 0x13b   :  { %v154_v19 = vsel %vm40_vm0, %v146_v16, 0.0 }
 0x13c   :  { %v150_v20 = vrot.slane %v149_v17, 2  ;;  %v155_v21 = vrot.slane %v154_v19, 4  ;;  %v127_v27 = vpop.permute.xlu1 %126 }
 0x13d   :  { %v132_v32 = vrot.slane %v127_v27, %v311_v23 }
 0x13e   :  { %v151_v24 = vadd.f32 %v150_v20, %v149_v17  ;;  %v156_v25 = vadd.f32 %v155_v21, %v154_v19 }
 0x13f   :  { %v134_v36 = vmul.f32 %v132_v32, %v114_v2 }
 0x140   :  { %v152_v28 = vrot.slane %v151_v24, 1  ;;  %v157_v0 = vrot.slane %v156_v25, 2 }
 0x142   :  { %v153_v30 = vadd.f32 %v152_v28, %v151_v24  ;;  %v158_v31 = vadd.f32 %v157_v0, %v156_v25 }
 0x144   :  { %v161_v33 = vadd.f32 %v153_v30, %v133_v29  ;;  %v159_v34 = vrot.slane %v158_v31, 1 }
 0x146   :  { %164 = vst.msk [vmem:[#allocation4] sm:$0x1] %vm24_vm2, %v161_v33  ;;  %v160_v35 = vadd.f32 %v159_v34, %v158_v31 }
 0x148   :  { %v162_v37 = vadd.f32 %v160_v35, %v134_v36 }
 0x14a   :  { %165 = vst.msk [vmem:[#allocation4 + $0x1] sm:$0x1] %vm24_vm2, %v162_v37 }
 0x14d   :  { %v180_v38 = vpop.permute.xlu1 %179  ;;  %v171_v43 = vld [vmem:[#allocation4] sm:$0x1] }
 0x14e   :  { %v185_v39 = vrot.slane %v180_v38, %v311_v23 }
 0x150   :  { %234 = vrcp.f32 %v185_v39 }
 0x151   :  { %v189_v40 = vpop.permute.xlu1 %188  ;;  %v172_v46 = vld [vmem:[#allocation4 + $0x1] sm:$0x1] }
 0x152   :  { %v194_v41 = vrot.slane %v189_v40, %v311_v23 }
 0x154   :  { %236 = vrcp.f32 %v194_v41 }
 0x15a   :  { %v235_v42 = vpop.eup %234 }
 0x15b   :  { %v196_v44 = vmul.f32 %v235_v42, %v171_v43 }
 0x15d   :  { %199 = vst.msk [vmem:[#allocation5] sm:$0x1] %vm24_vm2, %v196_v44 }
 0x15e   :  { %v237_v45 = vpop.eup %236 }
 0x15f   :  { %v198_v47 = vmul.f32 %v237_v45, %v172_v46 }
 0x161   :  { %200 = vst.msk [vmem:[#allocation5 + $0x1] sm:$0x1] %vm24_vm2, %v198_v47 }
 0x162   :  { %249 = shalt.err (!%p246_p4)
}
 0x163   :  { %s250_s24 = scalar_lea.hbm %s352_s3, 32 }
 0x164   :  { %p251_p5 = scmp.ne.s32.totalorder %s352_s3, %s250_s24  ;;  %p254_p6 = scmp.lt.u32.totalorder %s250_s24, %s352_s3 }
 0x166   :  { %p256_p7 = pnand %p254_p6, %p251_p5 }
 0x168   :  { %259 = shalt.err (!%p256_p7)
}
 0x169   :  { %s266_s29 = smov 16   ;;  %s267_s30 = smov 1  }
 0x16a   :  { %212 = dma.vmem_to_hbm [thread:$0]  %s207_s20, 32, %s352_s3, [#allocation6], %s266_s29, %s266_s29, %s267_s30  }
 0x16b   :  { %260 = dma.done.wait [#allocation6], 32  }
 0x16c   :  { %261 = vsyncadd [#allocation6], 4294967264 }
 0x16d   :  { %216 = vsyncpa [#allocation6], 1 }

</bundles_post_ra>
